<compile_context>
chip_gen: v6e
topology: v6e:2x2x1
jax: 0.10.0
libtpu: 0.0.40
codegen_flags: <defaults>
</compile_context>

<pallas_src>
import math
import functools

import jax
import jax.numpy as jnp
from jax.experimental import pallas as pl
from jax.experimental.pallas import tpu as pltpu


# ---------------------------------------------------------------------------
# Kernels
# ---------------------------------------------------------------------------

def _msg_transform_kernel(h_ref, w_ref, norm_ref, msg_ref):
    """msg = norm * (h @ W), stored in bf16 (transform-then-aggregate layers)."""
    x = jnp.dot(h_ref[...].astype(jnp.float32), w_ref[...],
                preferred_element_type=jnp.float32)
    msg_ref[...] = (x * norm_ref[...]).astype(msg_ref.dtype)


def _msg_scale_kernel(h_ref, norm_ref, msg_ref):
    """msg = norm * h, stored in bf16 (aggregate-then-transform layers)."""
    msg_ref[...] = (h_ref[...].astype(jnp.float32) * norm_ref[...]).astype(msg_ref.dtype)


def _agg_kernel(a_ref, msg_ref, norm_ref, *rest,
                transform_after, apply_relu, msg_resident, tk):
    """Tiled aggregation: acc += A_tile @ msg, fused epilogue on the last k step.

    grid = (rows // tm, cols // tk); k (axis 1) is the reduction.
    Epilogue: out = acc * norm_dst [ @ W ] + bias [; relu].
    """
    if transform_after:
        w_ref, b_ref, o_ref, acc_ref = rest
    else:
        w_ref = None
        b_ref, o_ref, acc_ref = rest

    k = pl.program_id(1)

    @pl.when(k == 0)
    def _init():
        acc_ref[...] = jnp.zeros_like(acc_ref)

    # A is streamed as int8 (0/1 exact); convert in-register to bf16 so the
    # matmul runs the native bf16 MXU path with an f32 accumulator.
    a_bf16 = a_ref[...].astype(jnp.bfloat16)
    if msg_resident:
        start = pl.multiple_of(k * tk, tk)
        m = msg_ref[pl.ds(start, tk), :]
    else:
        m = msg_ref[...]
    acc_ref[...] += jnp.dot(a_bf16, m, preferred_element_type=jnp.float32)

    @pl.when(k == pl.num_programs(1) - 1)
    def _epilogue():
        out = acc_ref[...] * norm_ref[...]
        if transform_after:
            out = jnp.dot(out, w_ref[...], preferred_element_type=jnp.float32)
        out = out + b_ref[...]
        if apply_relu:
            out = jnp.maximum(out, 0.0)
        o_ref[...] = out.astype(o_ref.dtype)


# ---------------------------------------------------------------------------
# pallas_call wrappers
# ---------------------------------------------------------------------------

def _round_up(x, m):
    return ((x + m - 1) // m) * m


def transform_msg(h, w, norm, *, do_matmul, tm):
    """Row-tiled msg precompute; emits bf16 to halve msg HBM traffic."""
    npad, f_in = h.shape
    f_out = w.shape[1]
    f_msg = f_out if do_matmul else f_in
    if do_matmul:
        kernel = _msg_transform_kernel
        in_specs = [
            pl.BlockSpec((tm, f_in), lambda i: (i, 0)),     # h row tile
            pl.BlockSpec((f_in, f_out), lambda i: (0, 0)),  # W (resident)
            pl.BlockSpec((tm, 1), lambda i: (i, 0)),        # source norm
        ]
        args = (h, w, norm)
    else:
        kernel = _msg_scale_kernel
        in_specs = [
            pl.BlockSpec((tm, f_in), lambda i: (i, 0)),
            pl.BlockSpec((tm, 1), lambda i: (i, 0)),
        ]
        args = (h, norm)
    return pl.pallas_call(
        kernel,
        out_shape=jax.ShapeDtypeStruct((npad, f_msg), jnp.bfloat16),
        grid=(npad // tm,),
        in_specs=in_specs,
        out_specs=pl.BlockSpec((tm, f_msg), lambda i: (i, 0)),
        compiler_params=pltpu.CompilerParams(
            dimension_semantics=("parallel",)),
    )(*args)


def aggregate(adj_i8, msg, norm, w, b, f_out, *, tm, tk,
              transform_after, apply_relu, msg_resident):
    """out = epilogue(A @ msg), A streamed in (tm, tk) int8 tiles."""
    npad = adj_i8.shape[0]
    f_msg = msg.shape[1]
    kernel = functools.partial(_agg_kernel,
                               transform_after=transform_after,
                               apply_relu=apply_relu,
                               msg_resident=msg_resident,
                               tk=tk)
    if msg_resident:
        # DMA'd once per layer; block index never changes across the grid.
        msg_spec = pl.BlockSpec((npad, f_msg), lambda i, k: (0, 0))
    else:
        msg_spec = pl.BlockSpec((tk, f_msg), lambda i, k: (k, 0))

    in_specs = [
        # NOTE: if an xprof trace shows exposed DMA at the start of each k
        # sweep (most likely on v7x), add pipeline_mode=pl.Buffered(3) here.
        pl.BlockSpec((tm, tk), lambda i, k: (i, k)),        # A tile (int8)
        msg_spec,                                           # msg (bf16)
        pl.BlockSpec((tm, 1), lambda i, k: (i, 0)),         # destination norm
    ]
    args = [adj_i8, msg, norm]
    if transform_after:
        in_specs.append(pl.BlockSpec(w.shape, lambda i, k: (0, 0)))  # W (resident)
        args.append(w)
    in_specs.append(pl.BlockSpec(b.shape, lambda i, k: (0, 0)))      # bias (resident)
    args.append(b)

    return pl.pallas_call(
        kernel,
        out_shape=jax.ShapeDtypeStruct((npad, f_out), jnp.float32),
        grid=(npad // tm, npad // tk),
        in_specs=in_specs,
        out_specs=pl.BlockSpec((tm, f_out), lambda i, k: (i, 0)),
        scratch_shapes=[pltpu.VMEM((tm, f_msg), jnp.float32)],
        compiler_params=pltpu.CompilerParams(
            dimension_semantics=("parallel", "arbitrary")),
    )(*args)


# ---------------------------------------------------------------------------
# Model
# ---------------------------------------------------------------------------

def init_gcn_params(key, in_feats, n_hidden, n_classes, n_layers):
    """weight, bias ~ U(-stdv, stdv), stdv = 1/sqrt(out_feats) (reset_parameters)."""
    dims = [(in_feats, n_hidden)]
    for _ in range(n_layers - 1):
        dims.append((n_hidden, n_hidden))
    dims.append((n_hidden, n_classes))

    params = []
    for (fi, fo) in dims:
        key, kw, kb = jax.random.split(key, 3)
        stdv = 1.0 / math.sqrt(fo)
        w = jax.random.uniform(kw, (fi, fo), jnp.float32, minval=-stdv, maxval=stdv)
        b = jax.random.uniform(kb, (1, fo), jnp.float32, minval=-stdv, maxval=stdv)
        params.append((w, b))
    return params


def gcn_forward(features, adj, norm, params, *,
                tm=256, tk=512, msg_resident_bytes=8 << 20):
    """GCN.forward: all layers have ReLU except the last (activation=None).

    On v7x consider tk=1024..2048 (A tile >= 1 MiB of DMA per grid step);
    msg_resident_bytes is kept at 8 MiB so a resident msg copy per TensorCore
    fits comfortably even under v7x's 64 MiB/TC VMEM.
    """
    assert max(tm, tk) % min(tm, tk) == 0, "tm and tk must divide each other"
    n = features.shape[0]
    # Pad nodes so both tm and tk divide npad: big, aligned tiles and an even
    # row-tile count for the 2 TensorCores on v7x.  Padded rows/cols of A are
    # zero and padded norm is zero, so padded rows never affect real outputs.
    npad = _round_up(n, max(tm, tk, 128))
    pad = npad - n

    h = jnp.pad(features, ((0, pad), (0, 0))).astype(jnp.float32)
    a = jnp.pad(adj, ((0, pad), (0, pad))).astype(jnp.int8)       # 0/1 -> exact in int8
    nm = jnp.pad(norm, ((0, pad), (0, 0))).astype(jnp.float32)    # padded rows: norm = 0

    n_total = len(params)
    out_width = None
    for i, (w, b) in enumerate(params):
        f_in, f_out = w.shape
        last = (i == n_total - 1)
        apply_relu = not last

        if last:
            # Lane-dense final store: pad the classes dim to 128 with zero W
            # columns / zero bias; the extra columns are sliced off below.
            out_width = f_out
            f_out_pad = _round_up(f_out, 128)
            if f_out_pad != f_out:
                w = jnp.pad(w, ((0, 0), (0, f_out_pad - f_out)))
                b = jnp.pad(b, ((0, 0), (0, f_out_pad - f_out)))
                f_out = f_out_pad

        # Run the N^2 aggregation at the narrower feature width (identical math,
        # since the norm scalings are row-wise diagonal).
        transform_first = f_out <= f_in
        f_msg = f_out if transform_first else f_in

        msg = transform_msg(h, w, nm, do_matmul=transform_first, tm=tm)
        msg_resident = npad * f_msg * 2 <= msg_resident_bytes   # bf16 bytes
        h = aggregate(a, msg, nm, w, b, f_out, tm=tm, tk=tk,
                      transform_after=not transform_first,
                      apply_relu=apply_relu,
                      msg_resident=msg_resident)
    return h[:n, :out_width]


# ---------------------------------------------------------------------------
# Demo / self-check
# ---------------------------------------------------------------------------

if __name__ == "__main__":
    key = jax.random.PRNGKey(0)

    # Small synthetic graph (N not a multiple of 128 to exercise padding).
    N = 300
    in_feats = 16
    n_hidden = 32
    n_classes = 7
    n_layers = 2    # -> total layers: (in->hid) + (hid->hid) + (hid->classes)

    key, k_feat, k_adj = jax.random.split(key, 3)
    features = jax.random.normal(k_feat, (N, in_feats), jnp.float32)

    # Random directed adjacency, A[v, u] = 1 iff edge u -> v (plus self-loops).
    adj = (jax.random.uniform(k_adj, (N, N)) < 0.05).astype(jnp.float32)
    adj = jnp.maximum(adj, jnp.eye(N, dtype=jnp.float32))

    # norm = in_degree^{-1/2}, inf -> 0 (DGL GCN convention), shape (N, 1).
    degs = jnp.sum(adj, axis=1)
    norm = jnp.where(degs > 0, 1.0 / jnp.sqrt(degs), 0.0).reshape(N, 1).astype(jnp.float32)

    params = init_gcn_params(key, in_feats, n_hidden, n_classes, n_layers)

    out = gcn_forward(features, adj, norm, params)
    out = jax.block_until_ready(out)

    # Pure-JAX f32 reference of the same math.
    h_ref = features
    for i, (w, b) in enumerate(params):
        h_ref = norm * (adj @ (norm * (h_ref @ w))) + b
        if i < len(params) - 1:
            h_ref = jnp.maximum(h_ref, 0.0)

    assert out.shape == (N, n_classes)
    max_err = float(jnp.max(jnp.abs(out - h_ref)))
    # msg is rounded to bf16 inside the pipeline (accumulation stays f32), so
    # allow bf16-level tolerance against the pure f32 reference.
    assert jnp.allclose(out, h_ref, atol=2e-2, rtol=2e-2), max_err

    print("KERNEL_OK")
</pallas_src>

<mosaic_0001>
module attributes {stable_mosaic.version = 11 : i64} {
  func.func @_msg_scale_kernel(%arg0: i32, %arg1: memref<256x16xf32, #tpu.memory_space<vmem>>, %arg2: memref<256x1xf32, #tpu.memory_space<vmem>>, %arg3: memref<256x16xbf16, #tpu.memory_space<vmem>>) attributes {dimension_semantics = [#tpu.dimension_semantics<parallel>], iteration_bounds = array<i64: 2>, scalar_prefetch = 0 : i64, scratch_operands = 0 : i64, tpu.core_type = #tpu.core_type<tc>, window_params = [{transform_indices = @transform_0, window_bounds = array<i64: 256, 16>}, {transform_indices = @transform_1, window_bounds = array<i64: 256, 1>}, {transform_indices = @transform_2, window_bounds = array<i64: 256, 16>}]} {
    %c0 = arith.constant 0 : index
    %c0_0 = arith.constant 0 : index
    %0 = vector.load %arg1[%c0, %c0_0] : memref<256x16xf32, #tpu.memory_space<vmem>>, vector<256x16xf32>
    %c0_1 = arith.constant 0 : index
    %c0_2 = arith.constant 0 : index
    %1 = vector.load %arg2[%c0_1, %c0_2] : memref<256x1xf32, #tpu.memory_space<vmem>>, vector<256x1xf32>
    %2 = vector.broadcast %1 : vector<256x1xf32> to vector<256x16xf32>
    %3 = arith.mulf %0, %2 : vector<256x16xf32>
    %4 = arith.truncf %3 : vector<256x16xf32> to vector<256x16xbf16>
    %c0_3 = arith.constant 0 : index
    %c0_4 = arith.constant 0 : index
    %5 = vector.load %arg3[%c0_3, %c0_4] : memref<256x16xbf16, #tpu.memory_space<vmem>>, vector<256x16xbf16>
    tpu.vector_store %arg3[%c0_3, %c0_4], %4 {strides = array<i32>} : memref<256x16xbf16, #tpu.memory_space<vmem>>, vector<256x16xbf16>,
    return
  }
  func.func @transform_0(%arg0: i32) -> (i32, i32) {
    %c0_i32 = arith.constant 0 : i32
    %c0_i32_0 = arith.constant 0 : i32
    return %arg0, %c0_i32 : i32, i32
  }
  func.func @transform_1(%arg0: i32) -> (i32, i32) {
    %c0_i32 = arith.constant 0 : i32
    %c0_i32_0 = arith.constant 0 : i32
    return %arg0, %c0_i32 : i32, i32
  }
  func.func @transform_2(%arg0: i32) -> (i32, i32) {
    %c0_i32 = arith.constant 0 : i32
    %c0_i32_0 = arith.constant 0 : i32
    return %arg0, %c0_i32 : i32, i32
  }
}

</mosaic_0001>

<bundles_post_ra>
// kernel: tpu_custom_call.1
= control target key start
LH: loop header
LB: loop body
LE: loop exit
PB: predicated region body
PF: predicated region fallthrough
CT: control target
= control target key end

     0   :  { %s766_s9 = smov 0   ;;  %s928_s0 = inlined_call_operand.vmem [shape: f32[512,16], index: 0, kind: input, shape index: {}]   ;;  %s929_s1 = inlined_call_operand.vmem [shape: f32[512,1], index: 1, kind: input, shape index: {}]   ;;  %s930_s2 = inlined_call_operand.vmem [shape: bf16[512,16], index: 2, kind: output, shape index: {}]  }
   0x1 LB: > { %s654_s10 = sadd.s32 4294967295, %s748_s9   ;;  %p658_p0 = scmp.ge.s32.totalorder %s748_s9, 1  ;;  %s748_s9 = sphi %s766_s9, %s12_s9  }
   0x2   : > { %p124_p1 = scmp.lt.s32.totalorder %s748_s9, 3 }
   0x4   : > { %p125_p2 = pnand %p658_p0, %p124_p1 }
   0x5   : > { %s659_s11 = sshll.u32 (!%p125_p2), %s654_s10, 5 }
   0x6   : > { %128 = sbr.rel (%p125_p2) target bundleno = 204 (0xcc), region = 28  ;;  %p152_p3 = scmp.lt.s32.totalorder (!%p125_p2), %s659_s11, 63 }
   0xb   : > { %v750_v0 = vmov 0   ;;  %s932_s11 = smov (!%p152_p3, %s659_s11), 63  ;;  %vm553_vm0 = vcmask 125952  }
   0xc   : > { %741 = vset.pattern.permute.xlu1 %v750_v0  ;;  %740 = vset.pattern.permute.xlu0 %v750_v0  ;;  %s660_s12 = sshll.u32 %s932_s11, 3  ;;  %s664_s19 = sshll.u32 %s932_s11, 2 }
   0xd   : > { %s782_s15 = scalar_lea.vmem %s929_s1, %s660_s12  ;;  %s821_s18 = scalar_lea.vmem %s928_s0, %s660_s12 }
   0xe   : > { %v203_v1 = vld [vmem:[%s782_s15 + $0x10] sm:$0xff]  ;;  %v201_v2 = vld [vmem:[%s782_s15] sm:$0xff]  ;;  %v204_v3 = vld [vmem:[%s782_s15 + $0x18] sm:$0xff]  ;;  %s829_s22 = scalar_lea.vmem %s930_s2, %s664_s19 }
   0xf   : > { %245 = vperm.xlu1 %741, %v203_v1   ;;  %235 = vperm.xlu0 %740, %v201_v2   ;;  %v202_v4 = vld [vmem:[%s782_s15 + $0x8] sm:$0xff]  ;;  %v205_v6 = vld [vmem:[%s782_s15 + $0x20] sm:$0xff]  ;;  %v208_v7 = vld [vmem:[%s782_s15 + $0x38] sm:$0xff] }
  0x10   : > { %v206_v5 = vld [vmem:[%s782_s15 + $0x28] sm:$0xff]  ;;  %v207_v8 = vld [vmem:[%s782_s15 + $0x30] sm:$0xff]  ;;  %v209_v10 = vld [vmem:[%s782_s15 + $0x40] sm:$0xff] }
  0x11   : > { %v210_v9 = vld [vmem:[%s782_s15 + $0x48] sm:$0xff]  ;;  %v212_v11 = vld [vmem:[%s782_s15 + $0x58] sm:$0xff]  ;;  %v211_v12 = vld [vmem:[%s782_s15 + $0x50] sm:$0xff] }
  0x12   : > { %v214_v13 = vld [vmem:[%s782_s15 + $0x68] sm:$0xff]  ;;  %v213_v14 = vld [vmem:[%s782_s15 + $0x60] sm:$0xff]  ;;  %v216_v15 = vld [vmem:[%s782_s15 + $0x78] sm:$0xff] }
  0x13   : > { %250 = vperm.xlu1 %741, %v204_v3   ;;  %240 = vperm.xlu0 %740, %v202_v4   ;;  %v215_v16 = vld [vmem:[%s782_s15 + $0x70] sm:$0xff]  ;;  %v218_v17 = vld [vmem:[%s782_s15 + $0x88] sm:$0xff]  ;;  %v217_v18 = vld [vmem:[%s782_s15 + $0x80] sm:$0xff] }
  0x14   : > { %v220_v19 = vld [vmem:[%s782_s15 + $0x98] sm:$0xff]  ;;  %v219_v20 = vld [vmem:[%s782_s15 + $0x90] sm:$0xff]  ;;  %v222_v21 = vld [vmem:[%s782_s15 + $0xa8] sm:$0xff] }
  0x15   : > { %v221_v22 = vld [vmem:[%s782_s15 + $0xa0] sm:$0xff]  ;;  %v224_v23 = vld [vmem:[%s782_s15 + $0xb8] sm:$0xff]  ;;  %v223_v24 = vld [vmem:[%s782_s15 + $0xb0] sm:$0xff] }
  0x16   : > { %v226_v25 = vld [vmem:[%s782_s15 + $0xc8] sm:$0xff]  ;;  %v225_v26 = vld [vmem:[%s782_s15 + $0xc0] sm:$0xff]  ;;  %v228_v27 = vld [vmem:[%s782_s15 + $0xd8] sm:$0xff] }
  0x17   : > { %260 = vperm.xlu1 %741, %v206_v5   ;;  %255 = vperm.xlu0 %740, %v205_v6   ;;  %v227_v28 = vld [vmem:[%s782_s15 + $0xd0] sm:$0xff]  ;;  %v230_v29 = vld [vmem:[%s782_s15 + $0xe8] sm:$0xff]  ;;  %v229_v30 = vld [vmem:[%s782_s15 + $0xe0] sm:$0xff] }
  0x18   : > { %v232_v31 = vld [vmem:[%s782_s15 + $0xf8] sm:$0xff]  ;;  %v231_v32 = vld [vmem:[%s782_s15 + $0xf0] sm:$0xff]  ;;  %v169_v34 = vld [vmem:[%s821_s18] sm:$0xff] }
  0x19   : > { %v171_v33 = vld [vmem:[%s821_s18 + $0x10] sm:$0xff]  ;;  %v172_v39 = vld [vmem:[%s821_s18 + $0x18] sm:$0xff]  ;;  %v170_v40 = vld [vmem:[%s821_s18 + $0x8] sm:$0xff] }
  0x1a   : > { %v174_v47 = vld [vmem:[%s821_s18 + $0x28] sm:$0xff]  ;;  %v173_v48 = vld [vmem:[%s821_s18 + $0x20] sm:$0xff]  ;;  %v176_v55 = vld [vmem:[%s821_s18 + $0x38] sm:$0xff] }
  0x1b   : > { %270 = vperm.xlu1 %741, %v208_v7   ;;  %265 = vperm.xlu0 %740, %v207_v8   ;;  %v175_v56 = vld [vmem:[%s821_s18 + $0x30] sm:$0xff]  ;;  %v178_v63 = vld [vmem:[%s821_s18 + $0x48] sm:$0xff]  ;;  %v177_v0 = vld [vmem:[%s821_s18 + $0x40] sm:$0xff] }
  0x1c   : > { %v180_v7 = vld [vmem:[%s821_s18 + $0x58] sm:$0xff]  ;;  %v179_v8 = vld [vmem:[%s821_s18 + $0x50] sm:$0xff] }
  0x1f   : > { %280 = vperm.xlu1 %741, %v210_v9   ;;  %275 = vperm.xlu0 %740, %v209_v10  }
  0x23   : > { %290 = vperm.xlu1 %741, %v212_v11   ;;  %285 = vperm.xlu0 %740, %v211_v12  }
  0x27   : > { %300 = vperm.xlu1 %741, %v214_v13   ;;  %295 = vperm.xlu0 %740, %v213_v14  }
  0x2b   : > { %310 = vperm.xlu1 %741, %v216_v15   ;;  %305 = vperm.xlu0 %740, %v215_v16   ;;  %v182_v15 = vld [vmem:[%s821_s18 + $0x68] sm:$0xff]  ;;  %v181_v16 = vld [vmem:[%s821_s18 + $0x60] sm:$0xff] }
  0x2f   : > { %320 = vperm.xlu1 %741, %v218_v17   ;;  %315 = vperm.xlu0 %740, %v217_v18  }
  0x33   : > { %330 = vperm.xlu1 %741, %v220_v19   ;;  %325 = vperm.xlu0 %740, %v219_v20  }
  0x37   : > { %340 = vperm.xlu1 %741, %v222_v21   ;;  %335 = vperm.xlu0 %740, %v221_v22  }
  0x3b   : > { %350 = vperm.xlu1 %741, %v224_v23   ;;  %345 = vperm.xlu0 %740, %v223_v24   ;;  %v184_v23 = vld [vmem:[%s821_s18 + $0x78] sm:$0xff]  ;;  %v183_v24 = vld [vmem:[%s821_s18 + $0x70] sm:$0xff] }
  0x3f   : > { %360 = vperm.xlu1 %741, %v226_v25   ;;  %355 = vperm.xlu0 %740, %v225_v26  }
  0x43   : > { %370 = vperm.xlu1 %741, %v228_v27   ;;  %365 = vperm.xlu0 %740, %v227_v28  }
  0x47   : > { %380 = vperm.xlu1 %741, %v230_v29   ;;  %375 = vperm.xlu0 %740, %v229_v30  }
  0x4b   : > { %390 = vperm.xlu1 %741, %v232_v31   ;;  %385 = vperm.xlu0 %740, %v231_v32   ;;  %v186_v31 = vld [vmem:[%s821_s18 + $0x88] sm:$0xff]  ;;  %v185_v32 = vld [vmem:[%s821_s18 + $0x80] sm:$0xff] }
  0x8a   : > { %v246_v35 = vpop.permute.xlu1 %245  ;;  %v236_v36 = vpop.permute.xlu0 %235 }
  0x8b   : > { %v395_v37 = vmul.f32 %v246_v35, %v171_v33  ;;  %v393_v38 = vmul.f32 %v236_v36, %v169_v34 }
  0x8d   : > { %v701_v41 = vpack.c.bf16 %v395_v37, %v395_v37  ;;  %v699_v42 = vpack.c.bf16 %v393_v38, %v393_v38 }
  0x8e   : > { %v251_v43 = vpop.permute.xlu1 %250  ;;  %v241_v44 = vpop.permute.xlu0 %240 }
  0x8f   : > { %556 = vst.msk [vmem:[%s829_s22 + $0x8] sm:$0xf] %vm553_vm0, %v701_v41  ;;  %554 = vst.msk [vmem:[%s829_s22] sm:$0xf] %vm553_vm0, %v699_v42  ;;  %v396_v45 = vmul.f32 %v251_v43, %v172_v39  ;;  %v394_v46 = vmul.f32 %v241_v44, %v170_v40  ;;  %v188_v39 = vld [vmem:[%s821_s18 + $0x98] sm:$0xff]  ;;  %v187_v40 = vld [vmem:[%s821_s18 + $0x90] sm:$0xff] }
  0x91   : > { %v702_v49 = vpack.c.bf16 %v396_v45, %v396_v45  ;;  %v700_v50 = vpack.c.bf16 %v394_v46, %v394_v46 }
  0x92   : > { %v261_v51 = vpop.permute.xlu1 %260  ;;  %v256_v52 = vpop.permute.xlu0 %255 }
  0x93   : > { %557 = vst.msk [vmem:[%s829_s22 + $0xc] sm:$0xf] %vm553_vm0, %v702_v49  ;;  %555 = vst.msk [vmem:[%s829_s22 + $0x4] sm:$0xf] %vm553_vm0, %v700_v50  ;;  %v398_v53 = vmul.f32 %v261_v51, %v174_v47  ;;  %v397_v54 = vmul.f32 %v256_v52, %v173_v48  ;;  %v190_v47 = vld [vmem:[%s821_s18 + $0xa8] sm:$0xff]  ;;  %v189_v48 = vld [vmem:[%s821_s18 + $0xa0] sm:$0xff] }
  0x95   : > { %v704_v57 = vpack.c.bf16 %v398_v53, %v398_v53  ;;  %v703_v58 = vpack.c.bf16 %v397_v54, %v397_v54 }
  0x96   : > { %v271_v59 = vpop.permute.xlu1 %270  ;;  %v266_v60 = vpop.permute.xlu0 %265 }
  0x97   : > { %559 = vst.msk [vmem:[%s829_s22 + $0x14] sm:$0xf] %vm553_vm0, %v704_v57  ;;  %558 = vst.msk [vmem:[%s829_s22 + $0x10] sm:$0xf] %vm553_vm0, %v703_v58  ;;  %v400_v61 = vmul.f32 %v271_v59, %v176_v55  ;;  %v399_v62 = vmul.f32 %v266_v60, %v175_v56  ;;  %v192_v55 = vld [vmem:[%s821_s18 + $0xb8] sm:$0xff]  ;;  %v191_v56 = vld [vmem:[%s821_s18 + $0xb0] sm:$0xff] }
  0x99   : > { %v706_v1 = vpack.c.bf16 %v400_v61, %v400_v61  ;;  %v705_v2 = vpack.c.bf16 %v399_v62, %v399_v62 }
  0x9a   : > { %v281_v3 = vpop.permute.xlu1 %280  ;;  %v276_v4 = vpop.permute.xlu0 %275 }
  0x9b   : > { %561 = vst.msk [vmem:[%s829_s22 + $0x1c] sm:$0xf] %vm553_vm0, %v706_v1  ;;  %560 = vst.msk [vmem:[%s829_s22 + $0x18] sm:$0xf] %vm553_vm0, %v705_v2  ;;  %v402_v5 = vmul.f32 %v281_v3, %v178_v63  ;;  %v401_v6 = vmul.f32 %v276_v4, %v177_v0  ;;  %v194_v63 = vld [vmem:[%s821_s18 + $0xc8] sm:$0xff]  ;;  %v193_v0 = vld [vmem:[%s821_s18 + $0xc0] sm:$0xff] }
  0x9d   : > { %v708_v9 = vpack.c.bf16 %v402_v5, %v402_v5  ;;  %v707_v10 = vpack.c.bf16 %v401_v6, %v401_v6 }
  0x9e   : > { %v291_v11 = vpop.permute.xlu1 %290  ;;  %v286_v12 = vpop.permute.xlu0 %285 }
  0x9f   : > { %563 = vst.msk [vmem:[%s829_s22 + $0x24] sm:$0xf] %vm553_vm0, %v708_v9  ;;  %562 = vst.msk [vmem:[%s829_s22 + $0x20] sm:$0xf] %vm553_vm0, %v707_v10  ;;  %v404_v13 = vmul.f32 %v291_v11, %v180_v7  ;;  %v403_v14 = vmul.f32 %v286_v12, %v179_v8  ;;  %v196_v7 = vld [vmem:[%s821_s18 + $0xd8] sm:$0xff]  ;;  %v195_v8 = vld [vmem:[%s821_s18 + $0xd0] sm:$0xff] }
  0xa1   : > { %v710_v17 = vpack.c.bf16 %v404_v13, %v404_v13  ;;  %v709_v18 = vpack.c.bf16 %v403_v14, %v403_v14 }
  0xa2   : > { %v301_v19 = vpop.permute.xlu1 %300  ;;  %v296_v20 = vpop.permute.xlu0 %295 }
  0xa3   : > { %565 = vst.msk [vmem:[%s829_s22 + $0x2c] sm:$0xf] %vm553_vm0, %v710_v17  ;;  %564 = vst.msk [vmem:[%s829_s22 + $0x28] sm:$0xf] %vm553_vm0, %v709_v18  ;;  %v406_v21 = vmul.f32 %v301_v19, %v182_v15  ;;  %v405_v22 = vmul.f32 %v296_v20, %v181_v16  ;;  %v198_v15 = vld [vmem:[%s821_s18 + $0xe8] sm:$0xff]  ;;  %v197_v16 = vld [vmem:[%s821_s18 + $0xe0] sm:$0xff] }
  0xa5   : > { %v712_v25 = vpack.c.bf16 %v406_v21, %v406_v21  ;;  %v711_v26 = vpack.c.bf16 %v405_v22, %v405_v22 }
  0xa6   : > { %v311_v27 = vpop.permute.xlu1 %310  ;;  %v306_v28 = vpop.permute.xlu0 %305 }
  0xa7   : > { %567 = vst.msk [vmem:[%s829_s22 + $0x34] sm:$0xf] %vm553_vm0, %v712_v25  ;;  %566 = vst.msk [vmem:[%s829_s22 + $0x30] sm:$0xf] %vm553_vm0, %v711_v26  ;;  %v408_v29 = vmul.f32 %v311_v27, %v184_v23  ;;  %v407_v30 = vmul.f32 %v306_v28, %v183_v24  ;;  %v200_v23 = vld [vmem:[%s821_s18 + $0xf8] sm:$0xff]  ;;  %v199_v24 = vld [vmem:[%s821_s18 + $0xf0] sm:$0xff] }
  0xa9   : > { %v714_v33 = vpack.c.bf16 %v408_v29, %v408_v29  ;;  %v713_v34 = vpack.c.bf16 %v407_v30, %v407_v30 }
  0xaa   : > { %v321_v35 = vpop.permute.xlu1 %320  ;;  %v316_v36 = vpop.permute.xlu0 %315 }
  0xab   : > { %569 = vst.msk [vmem:[%s829_s22 + $0x3c] sm:$0xf] %vm553_vm0, %v714_v33  ;;  %568 = vst.msk [vmem:[%s829_s22 + $0x38] sm:$0xf] %vm553_vm0, %v713_v34  ;;  %v410_v37 = vmul.f32 %v321_v35, %v186_v31  ;;  %v409_v38 = vmul.f32 %v316_v36, %v185_v32 }
  0xad   : > { %v716_v41 = vpack.c.bf16 %v410_v37, %v410_v37  ;;  %v715_v42 = vpack.c.bf16 %v409_v38, %v409_v38 }
  0xae   : > { %v331_v43 = vpop.permute.xlu1 %330  ;;  %v326_v44 = vpop.permute.xlu0 %325 }
  0xaf   : > { %571 = vst.msk [vmem:[%s829_s22 + $0x44] sm:$0xf] %vm553_vm0, %v716_v41  ;;  %570 = vst.msk [vmem:[%s829_s22 + $0x40] sm:$0xf] %vm553_vm0, %v715_v42  ;;  %v412_v45 = vmul.f32 %v331_v43, %v188_v39  ;;  %v411_v46 = vmul.f32 %v326_v44, %v187_v40 }
  0xb1   : > { %v718_v49 = vpack.c.bf16 %v412_v45, %v412_v45  ;;  %v717_v50 = vpack.c.bf16 %v411_v46, %v411_v46 }
  0xb2   : > { %v341_v51 = vpop.permute.xlu1 %340  ;;  %v336_v52 = vpop.permute.xlu0 %335 }
  0xb3   : > { %573 = vst.msk [vmem:[%s829_s22 + $0x4c] sm:$0xf] %vm553_vm0, %v718_v49  ;;  %572 = vst.msk [vmem:[%s829_s22 + $0x48] sm:$0xf] %vm553_vm0, %v717_v50  ;;  %v414_v53 = vmul.f32 %v341_v51, %v190_v47  ;;  %v413_v54 = vmul.f32 %v336_v52, %v189_v48 }
  0xb5   : > { %v720_v57 = vpack.c.bf16 %v414_v53, %v414_v53  ;;  %v719_v58 = vpack.c.bf16 %v413_v54, %v413_v54 }
  0xb6   : > { %v351_v59 = vpop.permute.xlu1 %350  ;;  %v346_v60 = vpop.permute.xlu0 %345 }
  0xb7   : > { %575 = vst.msk [vmem:[%s829_s22 + $0x54] sm:$0xf] %vm553_vm0, %v720_v57  ;;  %574 = vst.msk [vmem:[%s829_s22 + $0x50] sm:$0xf] %vm553_vm0, %v719_v58  ;;  %v416_v61 = vmul.f32 %v351_v59, %v192_v55  ;;  %v415_v62 = vmul.f32 %v346_v60, %v191_v56 }
  0xb9   : > { %v722_v1 = vpack.c.bf16 %v416_v61, %v416_v61  ;;  %v721_v2 = vpack.c.bf16 %v415_v62, %v415_v62 }
  0xba   : > { %v361_v3 = vpop.permute.xlu1 %360  ;;  %v356_v4 = vpop.permute.xlu0 %355 }
  0xbb   : > { %577 = vst.msk [vmem:[%s829_s22 + $0x5c] sm:$0xf] %vm553_vm0, %v722_v1  ;;  %576 = vst.msk [vmem:[%s829_s22 + $0x58] sm:$0xf] %vm553_vm0, %v721_v2  ;;  %v418_v5 = vmul.f32 %v361_v3, %v194_v63  ;;  %v417_v6 = vmul.f32 %v356_v4, %v193_v0 }
  0xbd   : > { %v724_v9 = vpack.c.bf16 %v418_v5, %v418_v5  ;;  %v723_v10 = vpack.c.bf16 %v417_v6, %v417_v6 }
  0xbe   : > { %v371_v11 = vpop.permute.xlu1 %370  ;;  %v366_v12 = vpop.permute.xlu0 %365 }
  0xbf   : > { %579 = vst.msk [vmem:[%s829_s22 + $0x64] sm:$0xf] %vm553_vm0, %v724_v9  ;;  %578 = vst.msk [vmem:[%s829_s22 + $0x60] sm:$0xf] %vm553_vm0, %v723_v10  ;;  %v420_v13 = vmul.f32 %v371_v11, %v196_v7  ;;  %v419_v14 = vmul.f32 %v366_v12, %v195_v8 }
  0xc1   : > { %v726_v17 = vpack.c.bf16 %v420_v13, %v420_v13  ;;  %v725_v18 = vpack.c.bf16 %v419_v14, %v419_v14 }
  0xc2   : > { %v381_v19 = vpop.permute.xlu1 %380  ;;  %v376_v20 = vpop.permute.xlu0 %375 }
  0xc3   : > { %581 = vst.msk [vmem:[%s829_s22 + $0x6c] sm:$0xf] %vm553_vm0, %v726_v17  ;;  %580 = vst.msk [vmem:[%s829_s22 + $0x68] sm:$0xf] %vm553_vm0, %v725_v18  ;;  %v422_v21 = vmul.f32 %v381_v19, %v198_v15  ;;  %v421_v22 = vmul.f32 %v376_v20, %v197_v16 }
  0xc5   : > { %v728_v25 = vpack.c.bf16 %v422_v21, %v422_v21  ;;  %v727_v26 = vpack.c.bf16 %v421_v22, %v421_v22 }
  0xc6   : > { %v391_v27 = vpop.permute.xlu1 %390  ;;  %v386_v28 = vpop.permute.xlu0 %385 }
  0xc7   : > { %583 = vst.msk [vmem:[%s829_s22 + $0x74] sm:$0xf] %vm553_vm0, %v728_v25  ;;  %582 = vst.msk [vmem:[%s829_s22 + $0x70] sm:$0xf] %vm553_vm0, %v727_v26  ;;  %v424_v29 = vmul.f32 %v391_v27, %v200_v23  ;;  %v423_v30 = vmul.f32 %v386_v28, %v199_v24 }
  0xc9   : > { %v730_v31 = vpack.c.bf16 %v424_v29, %v424_v29  ;;  %v729_v32 = vpack.c.bf16 %v423_v30, %v423_v30 }
  0xcb   : > { %585 = vst.msk [vmem:[%s829_s22 + $0x7c] sm:$0xf] %vm553_vm0, %v730_v31  ;;  %584 = vst.msk [vmem:[%s829_s22 + $0x78] sm:$0xf] %vm553_vm0, %v729_v32 }
  0xcc PF: > { %s12_s9 = sadd.s32 1, %s748_s9  }
  0xcd   : > { %p9_p4 = scmp.ge.s32.totalorder %s12_s9, 4  }
  0xcf   :  { %11 = sbr.rel (!%p9_p4) target bundleno = 1 (0x1), region = 61 }

</bundles_post_ra>
